<compile_context>
chip_gen: v7x
topology: tpu7x:2x2x1
jax: 0.10.0
libtpu: 0.0.40
codegen_flags: <defaults>
</compile_context>

<pallas_src>
import functools

import jax
import jax.numpy as jnp
from jax.experimental import pallas as pl
from jax.experimental.pallas import tpu as pltpu

_LANES = 128
_DEFAULT_TILE_ROWS = 2048  # (2048, 128) f32 = 1 MiB per input block


def _per_elem_loss(sim_ref, tgt_ref, margin):
    sim = sim_ref[...].astype(jnp.float32)
    tgt = tgt_ref[...].astype(jnp.float32)
    repel = (1.0 - tgt) * jnp.maximum(sim - margin, 0.0)
    attract = tgt * (1.0 - sim)
    return repel + attract


def _cos_emb_reduce_kernel(sim_ref, tgt_ref, out_ref, *, margin, batch,
                           tile_rows, steps, full_blocks, mask_needed):
    p = pl.program_id(0)   # partition (parallel; one per TensorCore on v7x)
    i = pl.program_id(1)   # sequential step within the partition

    @pl.when(i == 0)
    def _():
        out_ref[...] = jnp.zeros_like(out_ref)

    per = _per_elem_loss(sim_ref, tgt_ref, margin)          # (tile_rows, 128) f32

    def vreg_partial(x):
        # (tile_rows, 128) -> (8, 128): whole-vreg VPU adds, no cross-lane XLU.
        return x.reshape(tile_rows // 8, 8, _LANES).sum(axis=0)

    if mask_needed:
        bidx = p * steps + i                    # logical (unclamped) block index

        @pl.when(bidx < full_blocks)            # block fully inside the batch
        def _():
            out_ref[...] += vreg_partial(per)

        @pl.when(bidx >= full_blocks)           # ragged / padded / phantom block
        def _():
            row = jax.lax.broadcasted_iota(jnp.int32, per.shape, 0)
            lane = jax.lax.broadcasted_iota(jnp.int32, per.shape, 1)
            gidx = (bidx * tile_rows + row) * _LANES + lane
            out_ref[...] += vreg_partial(jnp.where(gidx < batch, per, 0.0))
    else:
        out_ref[...] += vreg_partial(per)


def _cos_emb_none_kernel(sim_ref, tgt_ref, out_ref, *, margin):
    out_ref[...] = _per_elem_loss(sim_ref, tgt_ref, margin).astype(out_ref.dtype)


def _pick_tile_rows(rows, requested=None):
    """rows is already a multiple of 8; returned tile is a multiple of 8 (or 32)."""
    desired = _DEFAULT_TILE_ROWS if requested is None else max(1, int(requested))
    if desired >= rows:
        return rows                      # single full-extent block along sublanes
    if desired >= 32:
        return (desired // 32) * 32      # multiple of 32: keeps bf16/int8 packing aligned
    return max(8, (desired // 8) * 8)


def cos_emb_loss(sim, target, margin, reduction="mean", tile_rows=None,
                 num_partitions=2, out_dtype=None):
    """sim: (B,), target: (B,) 0/1 labels -> scalar ('mean'/'sum') or (B,) ('none')."""
    assert sim.shape == target.shape and sim.ndim == 1
    if reduction not in ("mean", "sum", "none"):
        raise ValueError(f"unknown reduction: {reduction}")

    b = sim.shape[0]
    rows = pl.cdiv(b, _LANES)
    rows8 = pl.cdiv(rows, 8) * 8                 # sublane-align (pad <= 1023 elems)
    padded_b = rows8 * _LANES
    tr = _pick_tile_rows(rows8, tile_rows)
    total_blocks = pl.cdiv(rows8, tr)

    def to_tiles(x):
        if padded_b != b:                        # no-op when B % 1024 == 0
            x = jnp.pad(x, (0, padded_b - b))
        return x.reshape(rows8, _LANES)

    sim2 = to_tiles(sim)                         # native dtype; f32 cast is in-kernel
    tgt2 = to_tiles(target)
    in_bytes = (sim.dtype.itemsize + target.dtype.itemsize) * b

    if reduction == "none":
        odt = jnp.dtype(out_dtype) if out_dtype is not None else sim2.dtype
        out = pl.pallas_call(
            functools.partial(_cos_emb_none_kernel, margin=float(margin)),
            out_shape=jax.ShapeDtypeStruct((rows8, _LANES), odt),
            grid=(total_blocks,),
            in_specs=[pl.BlockSpec((tr, _LANES), lambda i: (i, 0)),
                      pl.BlockSpec((tr, _LANES), lambda i: (i, 0))],
            out_specs=pl.BlockSpec((tr, _LANES), lambda i: (i, 0)),
            compiler_params=pltpu.CompilerParams(
                dimension_semantics=("parallel",)),
            cost_estimate=pl.CostEstimate(
                flops=5 * b, transcendentals=0,
                bytes_accessed=in_bytes + odt.itemsize * b),
        )(sim2, tgt2)
        flat = out.reshape(-1)
        return flat if padded_b == b else flat[:b]

    # 'mean' / 'sum': split the block range across P partitions (parallel axis ->
    # both v7x TensorCores), sequentially accumulate within each partition.
    P = max(1, min(int(num_partitions), total_blocks))
    steps = pl.cdiv(total_blocks, P)
    full_blocks = b // (tr * _LANES)                 # blocks with no out-of-batch lanes
    mask_needed = (P * steps * tr * _LANES) != b
    has_phantom = (P * steps) != total_blocks        # at most P-1 duplicate blocks

    if has_phantom:
        last_blk = total_blocks - 1
        in_map = lambda p, i: (jnp.minimum(p * steps + i, last_blk), 0)
    else:
        in_map = lambda p, i: (p * steps + i, 0)

    kernel = functools.partial(
        _cos_emb_reduce_kernel, margin=float(margin), batch=b, tile_rows=tr,
        steps=steps, full_blocks=full_blocks, mask_needed=mask_needed)

    partials = pl.pallas_call(
        kernel,
        out_shape=jax.ShapeDtypeStruct((P * 8, _LANES), jnp.float32),
        grid=(P, steps),
        in_specs=[pl.BlockSpec((tr, _LANES), in_map),
                  pl.BlockSpec((tr, _LANES), in_map)],
        out_specs=pl.BlockSpec((8, _LANES), lambda p, i: (p, 0)),
        compiler_params=pltpu.CompilerParams(
            dimension_semantics=("parallel", "arbitrary")),
        cost_estimate=pl.CostEstimate(
            flops=6 * b, transcendentals=0,
            bytes_accessed=in_bytes + P * 8 * _LANES * 4),
    )(sim2, tgt2)

    total = jnp.sum(partials)
    return total / b if reduction == "mean" else total


def _reference(sim, target, margin, reduction):
    sim = sim.astype(jnp.float32)
    target = target.astype(jnp.float32)
    repel = (1.0 - target) * jnp.maximum(sim - margin, 0.0)
    attract = target * (1.0 - sim)
    per_elem = repel + attract
    if reduction == "mean":
        return jnp.mean(per_elem)
    if reduction == "sum":
        return jnp.sum(per_elem)
    return per_elem


if __name__ == "__main__":
    key = jax.random.PRNGKey(0)
    ks = jax.random.split(key, 6)
    margin = 0.3

    cases = []
    # tiny batch (single ragged block, masked reduce path)
    b = 8
    cases.append((jax.random.uniform(ks[0], (b,), minval=-1.0, maxval=1.0,
                                     dtype=jnp.float32),
                  jax.random.bernoulli(ks[1], 0.5, (b,)).astype(jnp.float32),
                  None))
    # padded batch + multi-block grid + 2-partition reduce with a phantom block
    b = 3000
    cases.append((jax.random.uniform(ks[2], (b,), minval=-1.0, maxval=1.0,
                                     dtype=jnp.float32),
                  jax.random.bernoulli(ks[3], 0.5, (b,)).astype(jnp.float32),
                  8))
    # pad-free batch (B % 1024 == 0), narrow int8 target, default tile
    b = 2048
    cases.append((jax.random.uniform(ks[4], (b,), minval=-1.0, maxval=1.0,
                                     dtype=jnp.float32),
                  jax.random.bernoulli(ks[5], 0.5, (b,)).astype(jnp.int8),
                  None))

    ok = True
    for sim, tgt, tr in cases:
        for reduction in ("mean", "sum", "none"):
            out = cos_emb_loss(sim, tgt, margin, reduction, tile_rows=tr)
            out = jax.block_until_ready(out)
            ref = _reference(sim, tgt, margin, reduction)
            if not jnp.allclose(out, ref, atol=1e-5, rtol=1e-5):
                ok = False
                print(f"MISMATCH (B={sim.shape[0]}, tr={tr}, "
                      f"reduction={reduction}): {out} vs {ref}")

    if ok:
        print("KERNEL_OK")
</pallas_src>

<mosaic_0001>
module attributes {stable_mosaic.version = 11 : i64} {
  func.func @_cos_emb_reduce_kernel(%arg0: i32, %arg1: i32, %arg2: memref<8x128xf32, #tpu.memory_space<vmem>>, %arg3: memref<8x128xf32, #tpu.memory_space<vmem>>, %arg4: memref<8x128xf32, #tpu.memory_space<vmem>>) attributes {dimension_semantics = [#tpu.dimension_semantics<parallel>, #tpu.dimension_semantics<arbitrary>], iteration_bounds = array<i64: 1, 1>, scalar_prefetch = 0 : i64, scratch_operands = 0 : i64, tpu.core_type = #tpu.core_type<tc>, window_params = [{transform_indices = @transform_0, window_bounds = array<i64: 8, 128>}, {transform_indices = @transform_1, window_bounds = array<i64: 8, 128>}, {transform_indices = @transform_2, window_bounds = array<i64: 8, 128>}]} {
    %c0_i32 = arith.constant 0 : i32
    %0 = arith.cmpi eq, %arg1, %c0_i32 : i32
    %1 = arith.extui %0 : i1 to i32
    %c0_i32_0 = arith.constant 0 : i32
    %2 = arith.cmpi ne, %1, %c0_i32_0 : i32
    scf.if %2 {
      %cst_11 = arith.constant 0.000000e+00 : f32
      %24 = vector.broadcast %cst_11 : f32 to vector<8x128xf32>
      %c0_12 = arith.constant 0 : index
      %c0_13 = arith.constant 0 : index
      %25 = vector.load %arg4[%c0_12, %c0_13] : memref<8x128xf32, #tpu.memory_space<vmem>>, vector<8x128xf32>
      tpu.vector_store %arg4[%c0_12, %c0_13], %24 {strides = array<i32>} : memref<8x128xf32, #tpu.memory_space<vmem>>, vector<8x128xf32>,
    } else {
    }
    %c0 = arith.constant 0 : index
    %c0_1 = arith.constant 0 : index
    %3 = vector.load %arg2[%c0, %c0_1] : memref<8x128xf32, #tpu.memory_space<vmem>>, vector<8x128xf32>
    %c0_2 = arith.constant 0 : index
    %c0_3 = arith.constant 0 : index
    %4 = vector.load %arg3[%c0_2, %c0_3] : memref<8x128xf32, #tpu.memory_space<vmem>>, vector<8x128xf32>
    %cst = arith.constant 1.000000e+00 : f32
    %5 = vector.broadcast %cst : f32 to vector<8x128xf32>
    %6 = arith.subf %5, %4 : vector<8x128xf32>
    %cst_4 = arith.constant 3.000000e-01 : f32
    %7 = vector.broadcast %cst_4 : f32 to vector<8x128xf32>
    %8 = arith.subf %3, %7 : vector<8x128xf32>
    %cst_5 = arith.constant 0.000000e+00 : f32
    %9 = vector.broadcast %cst_5 : f32 to vector<8x128xf32>
    %10 = arith.maximumf %8, %9 : vector<8x128xf32>
    %11 = arith.mulf %6, %10 : vector<8x128xf32>
    %cst_6 = arith.constant 1.000000e+00 : f32
    %12 = vector.broadcast %cst_6 : f32 to vector<8x128xf32>
    %13 = arith.subf %12, %3 : vector<8x128xf32>
    %14 = arith.mulf %4, %13 : vector<8x128xf32>
    %15 = arith.addf %11, %14 : vector<8x128xf32>
    %c1_i32 = arith.constant 1 : i32
    %16 = arith.muli %arg0, %c1_i32 : i32
    %17 = arith.addi %16, %arg1 : i32
    %c0_i32_7 = arith.constant 0 : i32
    %18 = arith.cmpi slt, %17, %c0_i32_7 : i32
    %19 = arith.extui %18 : i1 to i32
    %c0_i32_8 = arith.constant 0 : i32
    %20 = arith.cmpi ne, %19, %c0_i32_8 : i32
    scf.if %20 {
      %c0_11 = arith.constant 0 : index
      %c0_12 = arith.constant 0 : index
      %24 = vector.load %arg4[%c0_11, %c0_12] : memref<8x128xf32, #tpu.memory_space<vmem>>, vector<8x128xf32>
      %25 = vector.shape_cast %15 : vector<8x128xf32> to vector<1x8x128xf32>
      %cst_13 = arith.constant dense<0.000000e+00> : vector<8x128xf32>
      %26 = vector.multi_reduction <add>, %25, %cst_13 [0] : vector<1x8x128xf32> to vector<8x128xf32>
      %27 = arith.addf %24, %26 : vector<8x128xf32>
      %c0_14 = arith.constant 0 : index
      %c0_15 = arith.constant 0 : index
      %28 = vector.load %arg4[%c0_14, %c0_15] : memref<8x128xf32, #tpu.memory_space<vmem>>, vector<8x128xf32>
      tpu.vector_store %arg4[%c0_14, %c0_15], %27 {strides = array<i32>} : memref<8x128xf32, #tpu.memory_space<vmem>>, vector<8x128xf32>,
    } else {
    }
    %c0_i32_9 = arith.constant 0 : i32
    %21 = arith.cmpi sge, %17, %c0_i32_9 : i32
    %22 = arith.extui %21 : i1 to i32
    %c0_i32_10 = arith.constant 0 : i32
    %23 = arith.cmpi ne, %22, %c0_i32_10 : i32
    scf.if %23 {
      %24 = tpu.iota {dimensions = array<i32: 0>} : vector<8x128xi32>
      %25 = tpu.iota {dimensions = array<i32: 1>} : vector<8x128xi32>
      %c8_i32 = arith.constant 8 : i32
      %26 = arith.muli %17, %c8_i32 : i32
      %27 = vector.broadcast %26 : i32 to vector<8x128xi32>
      %28 = arith.addi %27, %24 : vector<8x128xi32>
      %c128_i32 = arith.constant 128 : i32
      %29 = vector.broadcast %c128_i32 : i32 to vector<8x128xi32>
      %30 = arith.muli %28, %29 : vector<8x128xi32>
      %31 = arith.addi %30, %25 : vector<8x128xi32>
      %c0_11 = arith.constant 0 : index
      %c0_12 = arith.constant 0 : index
      %32 = vector.load %arg4[%c0_11, %c0_12] : memref<8x128xf32, #tpu.memory_space<vmem>>, vector<8x128xf32>
      %c8_i32_13 = arith.constant 8 : i32
      %33 = vector.broadcast %c8_i32_13 : i32 to vector<8x128xi32>
      %34 = arith.cmpi slt, %31, %33 : vector<8x128xi32>
      %cst_14 = arith.constant 0.000000e+00 : f32
      %35 = vector.broadcast %cst_14 : f32 to vector<8x128xf32>
      %36 = arith.select %34, %15, %35 : vector<8x128xi1>, vector<8x128xf32>
      %37 = vector.shape_cast %36 : vector<8x128xf32> to vector<1x8x128xf32>
      %cst_15 = arith.constant dense<0.000000e+00> : vector<8x128xf32>
      %38 = vector.multi_reduction <add>, %37, %cst_15 [0] : vector<1x8x128xf32> to vector<8x128xf32>
      %39 = arith.addf %32, %38 : vector<8x128xf32>
      %c0_16 = arith.constant 0 : index
      %c0_17 = arith.constant 0 : index
      %40 = vector.load %arg4[%c0_16, %c0_17] : memref<8x128xf32, #tpu.memory_space<vmem>>, vector<8x128xf32>
      tpu.vector_store %arg4[%c0_16, %c0_17], %39 {strides = array<i32>} : memref<8x128xf32, #tpu.memory_space<vmem>>, vector<8x128xf32>,
    } else {
    }
    return
  }
  func.func @transform_0(%arg0: i32, %arg1: i32) -> (i32, i32) {
    %c1_i32 = arith.constant 1 : i32
    %0 = arith.muli %arg0, %c1_i32 : i32
    %1 = arith.addi %0, %arg1 : i32
    %c0_i32 = arith.constant 0 : i32
    %c0_i32_0 = arith.constant 0 : i32
    return %1, %c0_i32 : i32, i32
  }
  func.func @transform_1(%arg0: i32, %arg1: i32) -> (i32, i32) {
    %c1_i32 = arith.constant 1 : i32
    %0 = arith.muli %arg0, %c1_i32 : i32
    %1 = arith.addi %0, %arg1 : i32
    %c0_i32 = arith.constant 0 : i32
    %c0_i32_0 = arith.constant 0 : i32
    return %1, %c0_i32 : i32, i32
  }
  func.func @transform_2(%arg0: i32, %arg1: i32) -> (i32, i32) {
    %c0_i32 = arith.constant 0 : i32
    %c0_i32_0 = arith.constant 0 : i32
    return %arg0, %c0_i32 : i32, i32
  }
}

</mosaic_0001>

<bundles_post_ra>
// kernel: tpu_custom_call.1
= control target key start
LH: loop header
LB: loop body
LE: loop exit
PB: predicated region body
PF: predicated region fallthrough
CT: control target
= control target key end

     0   :  { %7 = vsyncpa [#allocation3], 0  ;;  %s233_s0 = inlined_call_operand.hbm [shape: f32[8,128], index: 0, kind: input, shape index: {}]   ;;  %s234_s1 = inlined_call_operand.hbm [shape: f32[8,128], index: 1, kind: input, shape index: {}]   ;;  %s235_s2 = inlined_call_operand.hbm [shape: f32[8,128], index: 2, kind: output, shape index: {}]  }
   0x1   :  { %8 = vsyncpa [#allocation6], 0 }
   0x2   :  { %9 = vsyncpa [#allocation4], 0  ;;  %s179_s9 = smov [#allocation2]   ;;  %s180_s11 = smov [#allocation5]  }
   0x3   :  { %s19_s10 = sshll.u32 %s179_s9, 4  ;;  %s32_s12 = sshll.u32 %s180_s11, 4  ;;  %s20_s10 = int_to_ptr.vmem [resolvable:$true] %s19_s10  ;;  %s33_s12 = int_to_ptr.vmem [resolvable:$true] %s32_s12 }
   0x4   :  { %s107_s15 = scalar_lea.hbm %s233_s0, 128 }
   0x5   :  { %p108_p0 = scmp.ne.s32.totalorder %s233_s0, %s107_s15  ;;  %p111_p1 = scmp.lt.u32.totalorder %s107_s15, %s233_s0 }
   0x7   :  { %p113_p2 = pnand %p111_p1, %p108_p0 }
   0x9   :  { %116 = shalt.err (!%p113_p2)
}
   0xa   :  { %s117_s20 = scalar_lea.vmem %s20_s10, 128  ;;  %p122_p4 = scmp.lt.s32.totalorder %s20_s10, %s20_s10 }
   0xb   :  { %p118_p3 = scmp.ne.s32.totalorder %s20_s10, %s117_s20  ;;  %p123_p5 = scmp.lt.s32.totalorder %s117_s20, %s117_s20 }
   0xd   :  { %p124_p6 = por %p123_p5, %p122_p4 }
   0xf   :  { %p125_p7 = pnand %p124_p6, %p118_p3 }
  0x11   :  { %128 = shalt.err (!%p125_p7)
}
  0x12   :  { %22 = dma.hbm_to_vmem [thread:$0]  %s233_s0, 128, %s20_s10, [#allocation3]  }
  0x13   :  { %s129_s25 = scalar_lea.hbm %s234_s1, 128 }
  0x14   :  { %p130_p8 = scmp.ne.s32.totalorder %s234_s1, %s129_s25  ;;  %p133_p9 = scmp.lt.u32.totalorder %s129_s25, %s234_s1 }
  0x16   :  { %p135_p10 = pnand %p133_p9, %p130_p8 }
  0x18   :  { %138 = shalt.err (!%p135_p10)
}
  0x19   :  { %s139_s30 = scalar_lea.vmem %s33_s12, 128  ;;  %p144_p12 = scmp.lt.s32.totalorder %s33_s12, %s33_s12 }
  0x1a   :  { %p140_p11 = scmp.ne.s32.totalorder %s33_s12, %s139_s30  ;;  %p145_p13 = scmp.lt.s32.totalorder %s139_s30, %s139_s30 }
  0x1c   :  { %p146_p0 = por %p145_p13, %p144_p12 }
  0x1e   :  { %p147_p1 = pnand %p146_p0, %p140_p11 }
  0x20   :  { %150 = shalt.err (!%p147_p1)
}
  0x21   :  { %35 = dma.hbm_to_vmem [thread:$0]  %s234_s1, 128, %s33_s12, [#allocation6]  }
  0x22   :  { %173 = dma.done.wait [#allocation3], 128  }
  0x23   :  { %174 = vsyncadd [#allocation3], 4294967168 }
  0x24   :  { %175 = dma.done.wait [#allocation6], 128  }
  0x25   :  { %176 = vsyncadd [#allocation6], 4294967168  ;;  %v71_v0 = vlaneseq  ;;  %v49_v4 = vld [vmem:[#allocation2] sm:$0xff]  ;;  %v50_v5 = vld [vmem:[#allocation5] sm:$0xff]  ;;  %s181_s1 = smov [#allocation7]  }
  0x26   :  { %v51_v6 = vsub.f32 1.0, %v50_v5  ;;  %v102_v7 = vadd.f32 -0.3, %v49_v4  ;;  %v55_v8 = vsub.f32 1.0, %v49_v4  ;;  %s92_s4 = sshll.u32 %s181_s1, 4  ;;  %s93_s4 = int_to_ptr.vmem [resolvable:$true] %s92_s4 }
  0x27   :  { %v72_v1 = vshrl.u32 %v71_v0, 7  ;;  %v74_v2 = vand.u32 127, %v71_v0  ;;  %s151_s5 = scalar_lea.vmem %s93_s4, 128  ;;  %p156_p3 = scmp.lt.s32.totalorder %s93_s4, %s93_s4 }
  0x28   :  { %v53_v10 = vmax.f32 %v102_v7, 0.0  ;;  %v56_v11 = vmul.f32 %v55_v8, %v50_v5  ;;  %p152_p2 = scmp.ne.s32.totalorder %s93_s4, %s151_s5  ;;  %p157_p4 = scmp.lt.s32.totalorder %s151_s5, %s151_s5 }
  0x29   :  { %v78_v3 = vmul.u32 128, %v72_v1 }
  0x2a   :  { %v54_v12 = vmul.f32 %v53_v10, %v51_v6  ;;  %p158_p5 = por %p157_p4, %p156_p3 }
  0x2b   :  { %v79_v9 = vadd.s32 %v78_v3, %v74_v2 }
  0x2c   :  { %v57_v13 = vadd.f32 %v56_v11, %v54_v12  ;;  %p159_p6 = pnand %p158_p5, %p152_p2 }
  0x2d   :  { %vm81_vm0 = vcmp.lt.s32.totalorder %v79_v9, 8 }
  0x2e   :  { %v82_v14 = vsel %vm81_vm0, %v57_v13, 0.0 }
  0x2f   :  { %85 = vst [vmem:[#allocation7] sm:$0xff] %v82_v14 }
  0x30   :  { %162 = shalt.err (!%p159_p6)
}
  0x31   :  { %s163_s8 = scalar_lea.hbm %s235_s2, 128 }
  0x32   :  { %p164_p7 = scmp.ne.s32.totalorder %s235_s2, %s163_s8  ;;  %p167_p8 = scmp.lt.u32.totalorder %s163_s8, %s235_s2 }
  0x34   :  { %p169_p9 = pnand %p167_p8, %p164_p7 }
  0x36   :  { %172 = shalt.err (!%p169_p9)
}
  0x37   :  { %95 = dma.vmem_to_hbm [thread:$0]  %s93_s4, 128, %s235_s2, [#allocation4]  }
  0x38   :  { %177 = dma.done.wait [#allocation4], 128  }
  0x39   :  { %178 = vsyncadd [#allocation4], 4294967168 }
  0x3a   :  { %99 = vsyncpa [#allocation3], 1 }
  0x3b   :  { %100 = vsyncpa [#allocation6], 1 }
  0x3c   :  { %101 = vsyncpa [#allocation4], 1 }

</bundles_post_ra>
